<compile_context>
chip_gen: v5e
topology: v5e:2x2
jax: 0.10.0
libtpu: 0.0.40
codegen_flags: <defaults>
</compile_context>

<pallas_src>
import functools

import jax
import jax.numpy as jnp
from jax.experimental import pallas as pl
from jax.experimental.pallas import tpu as pltpu


def _make_mlp_kernel(n_layers):
    """Fused MLP kernel: x @ W0 + b0 -> ReLU -> ... -> @ W_{L-1} + b_{L-1}."""

    def kernel(*refs):
        # refs = (x_ref, w0, b0, w1, b1, ..., w_{L-1}, b_{L-1}, o_ref)
        x_ref = refs[0]
        o_ref = refs[-1]
        param_refs = refs[1:-1]

        h = x_ref[...].astype(jnp.float32)
        for li in range(n_layers):
            w = param_refs[2 * li][...].astype(jnp.float32)
            b = param_refs[2 * li + 1][...].astype(jnp.float32)
            # MXU matmul with f32 accumulation, bias broadcast over rows (VPU).
            h = jnp.dot(h, w, preferred_element_type=jnp.float32) + b
            if li < n_layers - 1:
                h = jnp.maximum(h, 0.0)  # ReLU (all but the final layer)
        o_ref[...] = h.astype(o_ref.dtype)

    return kernel


def mlp_forward(x, params, *, n_inputs, tile_m=512):
    """Pallas equivalent of MLP.forward.

    params: list of (w, b) per layer; w has shape (fan_in, fan_out)
            (i.e. the transpose of torch.nn.Linear.weight), b has shape
            (1, fan_out).
    """
    # Reshape(-1, n_inputs): metadata only, no kernel needed.
    x2d = jnp.reshape(x, (-1, n_inputs))
    m = x2d.shape[0]
    n_layers = len(params)
    n_outputs = params[-1][0].shape[1]

    # Tile the batch dim: multiple-of-8 divisor when possible, else full array
    # (a full-array block is always legal regardless of the (8,128) rule).
    if m > tile_m and m % 8 == 0:
        tm = tile_m
        while m % tm != 0:
            tm -= 8
        tm = max(tm, 8)
    else:
        tm = m
    grid = (m // tm,)

    in_specs = [pl.BlockSpec((tm, n_inputs), lambda i: (i, 0))]
    flat_params = []
    for w, b in params:
        fan_in, fan_out = w.shape
        # Weights / biases: same block for every grid step -> stay VMEM-resident.
        in_specs.append(pl.BlockSpec((fan_in, fan_out), lambda i: (0, 0)))
        in_specs.append(pl.BlockSpec((1, fan_out), lambda i: (0, 0)))
        flat_params += [w, b]

    out = pl.pallas_call(
        _make_mlp_kernel(n_layers),
        out_shape=jax.ShapeDtypeStruct((m, n_outputs), x.dtype),
        grid_spec=pltpu.PrefetchScalarGridSpec(
            num_scalar_prefetch=0,
            grid=grid,
            in_specs=in_specs,
            out_specs=pl.BlockSpec((tm, n_outputs), lambda i: (i, 0)),
        ),
        compiler_params=pltpu.CompilerParams(
            dimension_semantics=("parallel",),
        ),
    )(x2d, *flat_params)
    return out


if __name__ == "__main__":
    key = jax.random.PRNGKey(0)

    # Small shapes consistent with the module: NCHW conv-style features fed to
    # MLP(n_inputs=C*H*W, n_outputs=8, n_hidden_layers=2, n_units_per_layer=128).
    B, C, H, W = 2, 4, 16, 16
    n_inputs = C * H * W          # 1024
    n_units_per_layer = 128
    n_hidden_layers = 2
    n_outputs = 8

    dims = [n_inputs] + [n_units_per_layer] * n_hidden_layers + [n_outputs]
    n_layers = len(dims) - 1

    keys = jax.random.split(key, 1 + 2 * n_layers)
    x = jax.random.normal(keys[0], (B, C, H, W), dtype=jnp.float32)

    params = []
    kidx = 1
    for li in range(n_layers):
        fan_in, fan_out = dims[li], dims[li + 1]
        bound = 1.0 / float(fan_in) ** 0.5  # torch.nn.Linear default init range
        w = jax.random.uniform(keys[kidx], (fan_in, fan_out), jnp.float32,
                               minval=-bound, maxval=bound)
        b = jax.random.uniform(keys[kidx + 1], (1, fan_out), jnp.float32,
                               minval=-bound, maxval=bound)
        params.append((w, b))
        kidx += 2

    y = mlp_forward(x, params, n_inputs=n_inputs)
    y = jax.block_until_ready(y)

    # Pure-JAX reference with identical forward semantics.
    h = jnp.reshape(x, (-1, n_inputs))
    for li, (w, b) in enumerate(params):
        h = jnp.dot(h, w, preferred_element_type=jnp.float32) + b
        if li < n_layers - 1:
            h = jnp.maximum(h, 0.0)
    ref = h.astype(x.dtype)

    assert y.shape == ref.shape == (B, n_outputs), (y.shape, ref.shape)
    assert y.dtype == ref.dtype
    assert bool(jnp.allclose(y, ref, atol=1e-3, rtol=1e-3)), (
        float(jnp.max(jnp.abs(y - ref))))

    print("KERNEL_OK")
</pallas_src>

<mosaic_0001>
module attributes {stable_mosaic.version = 11 : i64} {
  func.func @kernel(%arg0: i32, %arg1: memref<2x1024xf32, #tpu.memory_space<vmem>>, %arg2: memref<1024x128xf32, #tpu.memory_space<vmem>>, %arg3: memref<1x128xf32, #tpu.memory_space<vmem>>, %arg4: memref<128x128xf32, #tpu.memory_space<vmem>>, %arg5: memref<1x128xf32, #tpu.memory_space<vmem>>, %arg6: memref<128x8xf32, #tpu.memory_space<vmem>>, %arg7: memref<1x8xf32, #tpu.memory_space<vmem>>, %arg8: memref<2x8xf32, #tpu.memory_space<vmem>>) attributes {dimension_semantics = [#tpu.dimension_semantics<parallel>], iteration_bounds = array<i64: 1>, scalar_prefetch = 0 : i64, scratch_operands = 0 : i64, tpu.core_type = #tpu.core_type<tc>, window_params = [{transform_indices = @transform_0, window_bounds = array<i64: 2, 1024>}, {pipeline_mode = #tpu.pipeline_mode<synchronous>, transform_indices = @transform_1, window_bounds = array<i64: 1024, 128>}, {pipeline_mode = #tpu.pipeline_mode<synchronous>, transform_indices = @transform_2, window_bounds = array<i64: 1, 128>}, {pipeline_mode = #tpu.pipeline_mode<synchronous>, transform_indices = @transform_3, window_bounds = array<i64: 128, 128>}, {pipeline_mode = #tpu.pipeline_mode<synchronous>, transform_indices = @transform_4, window_bounds = array<i64: 1, 128>}, {pipeline_mode = #tpu.pipeline_mode<synchronous>, transform_indices = @transform_5, window_bounds = array<i64: 128, 8>}, {pipeline_mode = #tpu.pipeline_mode<synchronous>, transform_indices = @transform_6, window_bounds = array<i64: 1, 8>}, {transform_indices = @transform_7, window_bounds = array<i64: 2, 8>}]} {
    %c0 = arith.constant 0 : index
    %c0_0 = arith.constant 0 : index
    %0 = vector.load %arg1[%c0, %c0_0] : memref<2x1024xf32, #tpu.memory_space<vmem>>, vector<2x1024xf32>
    %c0_1 = arith.constant 0 : index
    %c0_2 = arith.constant 0 : index
    %1 = vector.load %arg2[%c0_1, %c0_2] : memref<1024x128xf32, #tpu.memory_space<vmem>>, vector<1024x128xf32>
    %c0_3 = arith.constant 0 : index
    %c0_4 = arith.constant 0 : index
    %2 = vector.load %arg3[%c0_3, %c0_4] : memref<1x128xf32, #tpu.memory_space<vmem>>, vector<1x128xf32>
    %cst = arith.constant dense<0.000000e+00> : vector<2x128xf32>
    %3 = tpu.matmul %0, %1, %cst {dimension_numbers = #tpu.dot_dimension_numbers<[1], [0], [0], [1], [0, 0, 1, 1], [], []>} : vector<2x1024xf32>, vector<1024x128xf32>, vector<2x128xf32> -> vector<2x128xf32>
    %4 = vector.broadcast %2 : vector<1x128xf32> to vector<2x128xf32>
    %5 = arith.addf %3, %4 : vector<2x128xf32>
    %cst_5 = arith.constant 0.000000e+00 : f32
    %6 = vector.broadcast %cst_5 : f32 to vector<2x128xf32>
    %7 = arith.maximumf %5, %6 : vector<2x128xf32>
    %c0_6 = arith.constant 0 : index
    %c0_7 = arith.constant 0 : index
    %8 = vector.load %arg4[%c0_6, %c0_7] : memref<128x128xf32, #tpu.memory_space<vmem>>, vector<128x128xf32>
    %c0_8 = arith.constant 0 : index
    %c0_9 = arith.constant 0 : index
    %9 = vector.load %arg5[%c0_8, %c0_9] : memref<1x128xf32, #tpu.memory_space<vmem>>, vector<1x128xf32>
    %cst_10 = arith.constant dense<0.000000e+00> : vector<2x128xf32>
    %10 = tpu.matmul %7, %8, %cst_10 {dimension_numbers = #tpu.dot_dimension_numbers<[1], [0], [0], [1], [0, 0, 1, 1], [], []>} : vector<2x128xf32>, vector<128x128xf32>, vector<2x128xf32> -> vector<2x128xf32>
    %11 = vector.broadcast %9 : vector<1x128xf32> to vector<2x128xf32>
    %12 = arith.addf %10, %11 : vector<2x128xf32>
    %cst_11 = arith.constant 0.000000e+00 : f32
    %13 = vector.broadcast %cst_11 : f32 to vector<2x128xf32>
    %14 = arith.maximumf %12, %13 : vector<2x128xf32>
    %c0_12 = arith.constant 0 : index
    %c0_13 = arith.constant 0 : index
    %15 = vector.load %arg6[%c0_12, %c0_13] : memref<128x8xf32, #tpu.memory_space<vmem>>, vector<128x8xf32>
    %c0_14 = arith.constant 0 : index
    %c0_15 = arith.constant 0 : index
    %16 = vector.load %arg7[%c0_14, %c0_15] : memref<1x8xf32, #tpu.memory_space<vmem>>, vector<1x8xf32>
    %cst_16 = arith.constant dense<0.000000e+00> : vector<2x8xf32>
    %17 = tpu.matmul %14, %15, %cst_16 {dimension_numbers = #tpu.dot_dimension_numbers<[1], [0], [0], [1], [0, 0, 1, 1], [], []>} : vector<2x128xf32>, vector<128x8xf32>, vector<2x8xf32> -> vector<2x8xf32>
    %18 = vector.broadcast %16 : vector<1x8xf32> to vector<2x8xf32>
    %19 = arith.addf %17, %18 : vector<2x8xf32>
    %c0_17 = arith.constant 0 : index
    %c0_18 = arith.constant 0 : index
    %20 = vector.load %arg8[%c0_17, %c0_18] : memref<2x8xf32, #tpu.memory_space<vmem>>, vector<2x8xf32>
    tpu.vector_store %arg8[%c0_17, %c0_18], %19 {strides = array<i32>} : memref<2x8xf32, #tpu.memory_space<vmem>>, vector<2x8xf32>,
    return
  }
  func.func @transform_0(%arg0: i32) -> (i32, i32) {
    %c0_i32 = arith.constant 0 : i32
    %c0_i32_0 = arith.constant 0 : i32
    return %arg0, %c0_i32 : i32, i32
  }
  func.func @transform_1(%arg0: i32) -> (i32, i32) {
    %c0_i32 = arith.constant 0 : i32
    %c0_i32_0 = arith.constant 0 : i32
    %c0_i32_1 = arith.constant 0 : i32
    return %c0_i32, %c0_i32_0 : i32, i32
  }
  func.func @transform_2(%arg0: i32) -> (i32, i32) {
    %c0_i32 = arith.constant 0 : i32
    %c0_i32_0 = arith.constant 0 : i32
    %c0_i32_1 = arith.constant 0 : i32
    return %c0_i32, %c0_i32_0 : i32, i32
  }
  func.func @transform_3(%arg0: i32) -> (i32, i32) {
    %c0_i32 = arith.constant 0 : i32
    %c0_i32_0 = arith.constant 0 : i32
    %c0_i32_1 = arith.constant 0 : i32
    return %c0_i32, %c0_i32_0 : i32, i32
  }
  func.func @transform_4(%arg0: i32) -> (i32, i32) {
    %c0_i32 = arith.constant 0 : i32
    %c0_i32_0 = arith.constant 0 : i32
    %c0_i32_1 = arith.constant 0 : i32
    return %c0_i32, %c0_i32_0 : i32, i32
  }
  func.func @transform_5(%arg0: i32) -> (i32, i32) {
    %c0_i32 = arith.constant 0 : i32
    %c0_i32_0 = arith.constant 0 : i32
    %c0_i32_1 = arith.constant 0 : i32
    return %c0_i32, %c0_i32_0 : i32, i32
  }
  func.func @transform_6(%arg0: i32) -> (i32, i32) {
    %c0_i32 = arith.constant 0 : i32
    %c0_i32_0 = arith.constant 0 : i32
    %c0_i32_1 = arith.constant 0 : i32
    return %c0_i32, %c0_i32_0 : i32, i32
  }
  func.func @transform_7(%arg0: i32) -> (i32, i32) {
    %c0_i32 = arith.constant 0 : i32
    %c0_i32_0 = arith.constant 0 : i32
    return %arg0, %c0_i32 : i32, i32
  }
}

</mosaic_0001>

<bundles_post_ra>
// kernel: tpu_custom_call.1
= control target key start
LH: loop header
LB: loop body
LE: loop exit
PB: predicated region body
PF: predicated region fallthrough
CT: control target
= control target key end

     0   :  { %12 = vsyncpa [#allocation3], 0  ;;  %s719_s0 = inlined_call_operand.hbm [shape: f32[2,1024], index: 0, kind: input, shape index: {}]   ;;  %s720_s1 = inlined_call_operand.hbm [shape: f32[1024,128], index: 1, kind: input, shape index: {}]   ;;  %s721_s2 = inlined_call_operand.vmem [shape: f32[1,128], index: 2, kind: input, shape index: {}]   ;;  %s722_s3 = inlined_call_operand.vmem [shape: f32[128,128], index: 3, kind: input, shape index: {}]   ;;  %s723_s4 = inlined_call_operand.vmem [shape: f32[1,128], index: 4, kind: input, shape index: {}]   ;;  %s724_s5 = inlined_call_operand.vmem [shape: f32[128,8], index: 5, kind: input, shape index: {}]   ;;  %s725_s6 = inlined_call_operand.vmem [shape: f32[1,8], index: 6, kind: input, shape index: {}]   ;;  %s726_s7 = inlined_call_operand.hbm [shape: f32[2,8], index: 7, kind: output, shape index: {}]  }
   0x1   :  { %13 = vsyncpa [#allocation6], 0 }
   0x2   :  { %14 = vsyncpa [#allocation4], 0  ;;  %s20_s26 = sshll.u32 %s719_s0, 4  ;;  %s560_s27 = smov [#allocation2]   ;;  %s21_s26 = int_to_ptr.hbm [resolvable:$true] %s20_s26 }
   0x3   :  { %s22_s28 = sshll.u32 %s560_s27, 4  ;;  %s30_s8 = sshll.u32 %s720_s1, 4  ;;  %s23_s28 = int_to_ptr.vmem [resolvable:$true] %s22_s28  ;;  %s31_s8 = int_to_ptr.hbm [resolvable:$true] %s30_s8 }
   0x4   :  { %25 = dma.hbm_to_vmem [thread:$0]  %s21_s26, 256, %s23_s28, [#allocation3]  }
   0x5   :  { %s561_s9 = smov [#allocation5]   ;;  %s562_s11 = smov 128  }
   0x6   :  { %s32_s10 = sshll.u32 %s561_s9, 4  ;;  %s563_s12 = smov 8   ;;  %s33_s10 = int_to_ptr.vmem [resolvable:$true] %s32_s10 }
   0x7   :  { %38 = dma.hbm_to_vmem [thread:$0]  %s31_s8, 16384, %s33_s10, [#allocation6], %s562_s11, %s562_s11, %s563_s12  }
   0x8   :  { %554 = dma.done.wait [#allocation3], 256  }
   0x9   :  { %555 = vsyncadd [#allocation3], 4294967040 }
   0xa   :  { %556 = dma.done.wait [#allocation6], 16384  }
   0xb   :  { %557 = vsyncadd [#allocation6], 4294950912  ;;  %v106_v0 = vld [vmem:[#allocation5 + $0x178] sm:$0xff]  ;;  %v105_v2 = vld [vmem:[#allocation5 + $0x170] sm:$0xff]  ;;  %s564_s28 = smov [#allocation7]   ;;  %s463_s9 = sshll.u32 %s726_s7, 4  ;;  %s464_s9 = int_to_ptr.hbm [resolvable:$true] %s463_s9 }
   0xc   :  { %v74_v1 = vld [vmem:[#allocation5 + $0x78] sm:$0xff]  ;;  %252 = vmatpush.msra.mxu2 %v106_v0  ;;  %v73_v4 = vld [vmem:[#allocation5 + $0x70] sm:$0xff]  ;;  %v104_v6 = vld [vmem:[#allocation5 + $0x168] sm:$0xff]  ;;  %s461_s29 = sshll.u32 %s564_s28, 4  ;;  %vm454_vm0 = vcmask 58368   ;;  %s462_s29 = int_to_ptr.vmem [resolvable:$true] %s461_s29 }
   0xd   :  { %212 = vmatpush.msra.mxu0 %v74_v1  ;;  %v122_v3 = vld [vmem:[#allocation5 + $0x1f8] sm:$0xff]  ;;  %v121_v7 = vld [vmem:[#allocation5 + $0x1f0] sm:$0xff]  ;;  %v72_v8 = vld [vmem:[#allocation5 + $0x68] sm:$0xff] }
   0xe   :  { %v90_v5 = vld [vmem:[#allocation5 + $0xf8] sm:$0xff]  ;;  %272 = vmatpush.msra.mxu3 %v122_v3  ;;  %253 = vmatpush.msra.mxu2 %v105_v2  ;;  %v89_v9 = vld [vmem:[#allocation5 + $0xf0] sm:$0xff]  ;;  %v120_v10 = vld [vmem:[#allocation5 + $0x1e8] sm:$0xff] }
   0xf   :  { %232 = vmatpush.msra.mxu1 %v90_v5  ;;  %213 = vmatpush.msra.mxu0 %v73_v4  ;;  %v103_v11 = vld [vmem:[#allocation5 + $0x160] sm:$0xff]  ;;  %v88_v13 = vld [vmem:[#allocation5 + $0xe8] sm:$0xff]  ;;  %v102_v16 = vld [vmem:[#allocation5 + $0x158] sm:$0xff] }
  0x10   :  { %273 = vmatpush.msra.mxu3 %v121_v7  ;;  %v71_v12 = vld [vmem:[#allocation5 + $0x60] sm:$0xff]  ;;  %254 = vmatpush.msra.mxu2 %v104_v6  ;;  %v70_v17 = vld [vmem:[#allocation5 + $0x58] sm:$0xff]  ;;  %v101_v20 = vld [vmem:[#allocation5 + $0x150] sm:$0xff] }
  0x11   :  { %233 = vmatpush.msra.mxu1 %v89_v9  ;;  %214 = vmatpush.msra.mxu0 %v72_v8  ;;  %v119_v14 = vld [vmem:[#allocation5 + $0x1e0] sm:$0xff]  ;;  %v118_v18 = vld [vmem:[#allocation5 + $0x1d8] sm:$0xff]  ;;  %v69_v21 = vld [vmem:[#allocation5 + $0x50] sm:$0xff] }
  0x12   :  { %v87_v15 = vld [vmem:[#allocation5 + $0xe0] sm:$0xff]  ;;  %274 = vmatpush.msra.mxu3 %v120_v10  ;;  %255 = vmatpush.msra.mxu2 %v103_v11  ;;  %v86_v19 = vld [vmem:[#allocation5 + $0xd8] sm:$0xff]  ;;  %v117_v22 = vld [vmem:[#allocation5 + $0x1d0] sm:$0xff] }
  0x13   :  { %234 = vmatpush.msra.mxu1 %v88_v13  ;;  %215 = vmatpush.msra.mxu0 %v71_v12  ;;  %v85_v23 = vld [vmem:[#allocation5 + $0xd0] sm:$0xff]  ;;  %v100_v24 = vld [vmem:[#allocation5 + $0x148] sm:$0xff]  ;;  %v99_v28 = vld [vmem:[#allocation5 + $0x140] sm:$0xff] }
  0x14   :  { %275 = vmatpush.msra.mxu3 %v119_v14  ;;  %256 = vmatpush.msra.mxu2 %v102_v16  ;;  %v68_v25 = vld [vmem:[#allocation5 + $0x48] sm:$0xff]  ;;  %v67_v29 = vld [vmem:[#allocation5 + $0x40] sm:$0xff]  ;;  %v98_v32 = vld [vmem:[#allocation5 + $0x138] sm:$0xff] }
  0x15   :  { %235 = vmatpush.msra.mxu1 %v87_v15  ;;  %216 = vmatpush.msra.mxu0 %v70_v17  ;;  %v116_v26 = vld [vmem:[#allocation5 + $0x1c8] sm:$0xff]  ;;  %v115_v30 = vld [vmem:[#allocation5 + $0x1c0] sm:$0xff]  ;;  %v66_v33 = vld [vmem:[#allocation5 + $0x38] sm:$0xff] }
  0x16   :  { %276 = vmatpush.msra.mxu3 %v118_v18  ;;  %257 = vmatpush.msra.mxu2 %v101_v20  ;;  %v84_v27 = vld [vmem:[#allocation5 + $0xc8] sm:$0xff]  ;;  %v83_v31 = vld [vmem:[#allocation5 + $0xc0] sm:$0xff]  ;;  %v114_v34 = vld [vmem:[#allocation5 + $0x1b8] sm:$0xff] }
  0x17   :  { %236 = vmatpush.msra.mxu1 %v86_v19  ;;  %217 = vmatpush.msra.mxu0 %v69_v21  ;;  %v82_v35 = vld [vmem:[#allocation5 + $0xb8] sm:$0xff]  ;;  %v97_v36 = vld [vmem:[#allocation5 + $0x130] sm:$0xff]  ;;  %v96_v40 = vld [vmem:[#allocation5 + $0x128] sm:$0xff] }
  0x18   :  { %277 = vmatpush.msra.mxu3 %v117_v22  ;;  %258 = vmatpush.msra.mxu2 %v100_v24  ;;  %v65_v37 = vld [vmem:[#allocation5 + $0x30] sm:$0xff]  ;;  %v64_v41 = vld [vmem:[#allocation5 + $0x28] sm:$0xff]  ;;  %v95_v44 = vld [vmem:[#allocation5 + $0x120] sm:$0xff] }
  0x19   :  { %237 = vmatpush.msra.mxu1 %v85_v23  ;;  %218 = vmatpush.msra.mxu0 %v68_v25  ;;  %v113_v38 = vld [vmem:[#allocation5 + $0x1b0] sm:$0xff]  ;;  %v112_v42 = vld [vmem:[#allocation5 + $0x1a8] sm:$0xff]  ;;  %v63_v45 = vld [vmem:[#allocation5 + $0x20] sm:$0xff] }
  0x1a   :  { %278 = vmatpush.msra.mxu3 %v116_v26  ;;  %259 = vmatpush.msra.mxu2 %v99_v28  ;;  %v81_v39 = vld [vmem:[#allocation5 + $0xb0] sm:$0xff]  ;;  %v80_v43 = vld [vmem:[#allocation5 + $0xa8] sm:$0xff]  ;;  %v111_v46 = vld [vmem:[#allocation5 + $0x1a0] sm:$0xff] }
  0x1b   :  { %238 = vmatpush.msra.mxu1 %v84_v27  ;;  %219 = vmatpush.msra.mxu0 %v67_v29  ;;  %v79_v47 = vld [vmem:[#allocation5 + $0xa0] sm:$0xff]  ;;  %v94_v48 = vld [vmem:[#allocation5 + $0x118] sm:$0xff]  ;;  %v93_v52 = vld [vmem:[#allocation5 + $0x110] sm:$0xff] }
  0x1c   :  { %279 = vmatpush.msra.mxu3 %v115_v30  ;;  %260 = vmatpush.msra.mxu2 %v98_v32  ;;  %v62_v49 = vld [vmem:[#allocation5 + $0x18] sm:$0xff]  ;;  %v61_v53 = vld [vmem:[#allocation5 + $0x10] sm:$0xff]  ;;  %v92_v56 = vld [vmem:[#allocation5 + $0x108] sm:$0xff] }
  0x1d   :  { %239 = vmatpush.msra.mxu1 %v83_v31  ;;  %220 = vmatpush.msra.mxu0 %v66_v33  ;;  %v110_v50 = vld [vmem:[#allocation5 + $0x198] sm:$0xff]  ;;  %v109_v54 = vld [vmem:[#allocation5 + $0x190] sm:$0xff]  ;;  %v60_v57 = vld [vmem:[#allocation5 + $0x8] sm:$0xff] }
  0x1e   :  { %280 = vmatpush.msra.mxu3 %v114_v34  ;;  %261 = vmatpush.msra.mxu2 %v97_v36  ;;  %v78_v51 = vld [vmem:[#allocation5 + $0x98] sm:$0xff]  ;;  %v77_v55 = vld [vmem:[#allocation5 + $0x90] sm:$0xff]  ;;  %v108_v58 = vld [vmem:[#allocation5 + $0x188] sm:$0xff] }
  0x1f   :  { %240 = vmatpush.msra.mxu1 %v82_v35  ;;  %221 = vmatpush.msra.mxu0 %v65_v37  ;;  %v76_v59 = vld [vmem:[#allocation5 + $0x88] sm:$0xff]  ;;  %v91_v60 = vld [vmem:[#allocation5 + $0x100] sm:$0xff]  ;;  %v170_v62 = vld [vmem:[#allocation5 + $0x378] sm:$0xff] }
  0x20   :  { %281 = vmatpush.msra.mxu3 %v113_v38  ;;  %262 = vmatpush.msra.mxu2 %v96_v40  ;;  %v59_v61 = vld [vmem:[#allocation5] sm:$0xff]  ;;  %v138_v0 = vld [vmem:[#allocation5 + $0x278] sm:$0xff]  ;;  %v169_v2 = vld [vmem:[#allocation5 + $0x370] sm:$0xff] }
  0x21   :  { %241 = vmatpush.msra.mxu1 %v81_v39  ;;  %222 = vmatpush.msra.mxu0 %v64_v41  ;;  %v107_v63 = vld [vmem:[#allocation5 + $0x180] sm:$0xff]  ;;  %v186_v1 = vld [vmem:[#allocation5 + $0x3f8] sm:$0xff]  ;;  %v137_v4 = vld [vmem:[#allocation5 + $0x270] sm:$0xff] }
  0x22   :  { %282 = vmatpush.msra.mxu3 %v112_v42  ;;  %263 = vmatpush.msra.mxu2 %v95_v44  ;;  %v75_v3 = vld [vmem:[#allocation5 + $0x80] sm:$0xff]  ;;  %v154_v5 = vld [vmem:[#allocation5 + $0x2f8] sm:$0xff]  ;;  %v168_v6 = vld [vmem:[#allocation5 + $0x368] sm:$0xff] }
  0x23   :  { %242 = vmatpush.msra.mxu1 %v80_v43  ;;  %223 = vmatpush.msra.mxu0 %v63_v45  ;;  %v185_v7 = vld [vmem:[#allocation5 + $0x3f0] sm:$0xff]  ;;  %v136_v8 = vld [vmem:[#allocation5 + $0x268] sm:$0xff]  ;;  %v167_v10 = vld [vmem:[#allocation5 + $0x360] sm:$0xff] }
  0x24   :  { %283 = vmatpush.msra.mxu3 %v111_v46  ;;  %264 = vmatpush.msra.mxu2 %v94_v48  ;;  %v153_v9 = vld [vmem:[#allocation5 + $0x2f0] sm:$0xff]  ;;  %v184_v11 = vld [vmem:[#allocation5 + $0x3e8] sm:$0xff]  ;;  %v135_v12 = vld [vmem:[#allocation5 + $0x260] sm:$0xff] }
  0x25   :  { %243 = vmatpush.msra.mxu1 %v79_v47  ;;  %224 = vmatpush.msra.mxu0 %v62_v49  ;;  %v152_v13 = vld [vmem:[#allocation5 + $0x2e8] sm:$0xff]  ;;  %v57_v14 = vld [vmem:[#allocation2] sm:$0xff]  ;;  %v166_v15 = vld [vmem:[#allocation5 + $0x358] sm:$0xff] }
  0x26   :  { %284 = vmatpush.msra.mxu3 %v110_v50  ;;  %265 = vmatpush.msra.mxu2 %v93_v52  ;;  %v183_v16 = vld [vmem:[#allocation5 + $0x3e0] sm:$0xff]  ;;  %193 = vst [vmem:[#allocation1] ss:$4 sm:$0xff] %v57_v14  ;;  %v134_v17 = vld [vmem:[#allocation5 + $0x258] sm:$0xff]  ;;  %v165_v19 = vld [vmem:[#allocation5 + $0x350] sm:$0xff] }
  0x27   :  { %244 = vmatpush.msra.mxu1 %v78_v51  ;;  %225 = vmatpush.msra.mxu0 %v61_v53  ;;  %v151_v18 = vld [vmem:[#allocation5 + $0x2e0] sm:$0xff]  ;;  %v182_v20 = vld [vmem:[#allocation5 + $0x3d8] sm:$0xff]  ;;  %v133_v21 = vld [vmem:[#allocation5 + $0x250] sm:$0xff] }
  0x28   :  { %285 = vmatpush.msra.mxu3 %v109_v54  ;;  %266 = vmatpush.msra.mxu2 %v92_v56  ;;  %v150_v22 = vld [vmem:[#allocation5 + $0x2d8] sm:$0xff]  ;;  %v164_v23 = vld [vmem:[#allocation5 + $0x348] sm:$0xff]  ;;  %v181_v24 = vld [vmem:[#allocation5 + $0x3d0] sm:$0xff] }
  0x29   :  { %245 = vmatpush.msra.mxu1 %v77_v55  ;;  %226 = vmatpush.msra.mxu0 %v60_v57  ;;  %v58_v25 = vld [vmem:[#allocation2 + $0x8] sm:$0xff]  ;;  %v132_v26 = vld [vmem:[#allocation5 + $0x248] sm:$0xff]  ;;  %v149_v27 = vld [vmem:[#allocation5 + $0x2d0] sm:$0xff] }
  0x2a   :  { %286 = vmatpush.msra.mxu3 %v108_v58  ;;  %267 = vmatpush.msra.mxu2 %v91_v60  ;;  %195 = vst [vmem:[#allocation1 + $0x20] ss:$4 sm:$0xff] %v58_v25  ;;  %v163_v28 = vld [vmem:[#allocation5 + $0x340] sm:$0xff]  ;;  %v180_v29 = vld [vmem:[#allocation5 + $0x3c8] sm:$0xff]  ;;  %v162_v32 = vld [vmem:[#allocation5 + $0x338] sm:$0xff] }
  0x2b   :  { %246 = vmatpush.msra.mxu1 %v76_v59  ;;  %227 = vmatpush.msra.mxu0 %v59_v61  ;;  %v131_v30 = vld [vmem:[#allocation5 + $0x240] sm:$0xff]  ;;  %v148_v31 = vld [vmem:[#allocation5 + $0x2c8] sm:$0xff]  ;;  %v130_v34 = vld [vmem:[#allocation5 + $0x238] sm:$0xff] }
  0x2c   :  { %332 = vmatpush.msrb.mxu2 %v170_v62  ;;  %287 = vmatpush.msra.mxu3 %v107_v63  ;;  %v179_v33 = vld [vmem:[#allocation5 + $0x3c0] sm:$0xff]  ;;  %v161_v36 = vld [vmem:[#allocation5 + $0x330] sm:$0xff]  ;;  %v178_v37 = vld [vmem:[#allocation5 + $0x3b8] sm:$0xff] }
  0x2d   :  { %292 = vmatpush.msrb.mxu0 %v138_v0  ;;  %247 = vmatpush.msra.mxu1 %v75_v3  ;;  %v147_v35 = vld [vmem:[#allocation5 + $0x2c0] sm:$0xff]  ;;  %v129_v38 = vld [vmem:[#allocation5 + $0x230] sm:$0xff]  ;;  %v146_v39 = vld [vmem:[#allocation5 + $0x2b8] sm:$0xff] }
  0x2e   :  { %352 = vmatpush.msrb.mxu3 %v186_v1  ;;  %333 = vmatpush.msrb.mxu2 %v169_v2  ;;  %v160_v40 = vld [vmem:[#allocation5 + $0x328] sm:$0xff]  ;;  %v177_v41 = vld [vmem:[#allocation5 + $0x3b0] sm:$0xff]  ;;  %v159_v44 = vld [vmem:[#allocation5 + $0x320] sm:$0xff] }
  0x2f   :  { %293 = vmatpush.msrb.mxu0 %v137_v4  ;;  %312 = vmatpush.msrb.mxu1 %v154_v5  ;;  %v128_v42 = vld [vmem:[#allocation5 + $0x228] sm:$0xff]  ;;  %v145_v43 = vld [vmem:[#allocation5 + $0x2b0] sm:$0xff]  ;;  %v198_v46 = vld.sshfl [vmem:[#allocation1 + $0x10] sm:$0xff pattern:$0x73625140] }
  0x30   :  { %334 = vmatpush.msrb.mxu2 %v168_v6  ;;  %353 = vmatpush.msrb.mxu3 %v185_v7  ;;  %v176_v45 = vld [vmem:[#allocation5 + $0x3a8] sm:$0xff]  ;;  %v127_v47 = vld [vmem:[#allocation5 + $0x220] sm:$0xff]  ;;  %v158_v49 = vld [vmem:[#allocation5 + $0x318] sm:$0xff] }
  0x31   :  { %294 = vmatpush.msrb.mxu0 %v136_v8  ;;  %313 = vmatpush.msrb.mxu1 %v153_v9  ;;  %v144_v48 = vld [vmem:[#allocation5 + $0x2a8] sm:$0xff]  ;;  %v175_v50 = vld [vmem:[#allocation5 + $0x3a0] sm:$0xff]  ;;  %v126_v53 = vld [vmem:[#allocation5 + $0x218] sm:$0xff] }
  0x32   :  { %335 = vmatpush.msrb.mxu2 %v167_v10  ;;  %354 = vmatpush.msrb.mxu3 %v184_v11  ;;  %v196_v51 = vld.sshfl [vmem:[#allocation1] sm:$0xff pattern:$0x73625140]  ;;  %v199_v52 = vld.sshfl [vmem:[#allocation1 + $0x18] sm:$0xff pattern:$0x73625140] }
  0x33   :  { %295 = vmatpush.msrb.mxu0 %v135_v12  ;;  %314 = vmatpush.msrb.mxu1 %v152_v13  ;;  %v143_v54 = vld [vmem:[#allocation5 + $0x2a0] sm:$0xff]  ;;  %v157_v55 = vld [vmem:[#allocation5 + $0x310] sm:$0xff]  ;;  %v174_v56 = vld [vmem:[#allocation5 + $0x398] sm:$0xff] }
  0x34   :  { %336 = vmatpush.msrb.mxu2 %v166_v15  ;;  %355 = vmatpush.msrb.mxu3 %v183_v16  ;;  %v197_v57 = vld.sshfl [vmem:[#allocation1 + $0x8] sm:$0xff pattern:$0x73625140]  ;;  %v142_v59 = vld [vmem:[#allocation5 + $0x298] sm:$0xff]  ;;  %v156_v60 = vld [vmem:[#allocation5 + $0x308] sm:$0xff] }
  0x35   :  { %296 = vmatpush.msrb.mxu0 %v134_v17  ;;  %315 = vmatpush.msrb.mxu1 %v151_v18  ;;  %v125_v58 = vld [vmem:[#allocation5 + $0x210] sm:$0xff]  ;;  %v124_v62 = vld [vmem:[#allocation5 + $0x208] sm:$0xff]  ;;  %v155_v0 = vld [vmem:[#allocation5 + $0x300] sm:$0xff] }
  0x36   :  { %337 = vmatpush.msrb.mxu2 %v165_v19  ;;  %356 = vmatpush.msrb.mxu3 %v182_v20  ;;  %v173_v61 = vld [vmem:[#allocation5 + $0x390] sm:$0xff]  ;;  %v172_v1 = vld [vmem:[#allocation5 + $0x388] sm:$0xff]  ;;  %v202_v2 = vld.sshfl [vmem:[#allocation1 + $0x30] sm:$0xff pattern:$0x73625140] }
  0x37   :  { %297 = vmatpush.msrb.mxu0 %v133_v21  ;;  %316 = vmatpush.msrb.mxu1 %v150_v22  ;;  %v141_v63 = vld [vmem:[#allocation5 + $0x290] sm:$0xff]  ;;  %v123_v3 = vld [vmem:[#allocation5 + $0x200] sm:$0xff]  ;;  %v140_v4 = vld [vmem:[#allocation5 + $0x288] sm:$0xff] }
  0x38   :  { %338 = vmatpush.msrb.mxu2 %v164_v23  ;;  %357 = vmatpush.msrb.mxu3 %v181_v24  ;;  %v171_v5 = vld [vmem:[#allocation5 + $0x380] sm:$0xff]  ;;  %v200_v6 = vld.sshfl [vmem:[#allocation1 + $0x20] sm:$0xff pattern:$0x73625140]  ;;  %v387_v11 = vld [vmem:[%s722_s3 + $0x70] sm:$0xff] }
  0x39   :  { %298 = vmatpush.msrb.mxu0 %v132_v26  ;;  %317 = vmatpush.msrb.mxu1 %v149_v27  ;;  %v203_v7 = vld.sshfl [vmem:[#allocation1 + $0x38] sm:$0xff pattern:$0x73625140]  ;;  %v201_v10 = vld.sshfl [vmem:[#allocation1 + $0x28] sm:$0xff pattern:$0x73625140] }
  0x3a   :  { %339 = vmatpush.msrb.mxu2 %v163_v28  ;;  %358 = vmatpush.msrb.mxu3 %v180_v29  ;;  %v139_v8 = vld [vmem:[#allocation5 + $0x280] sm:$0xff]  ;;  %v386_v12 = vld [vmem:[%s722_s3 + $0x68] sm:$0xff]  ;;  %v385_v13 = vld [vmem:[%s722_s3 + $0x60] sm:$0xff] }
  0x3b   :  { %299 = vmatpush.msrb.mxu0 %v131_v30  ;;  %318 = vmatpush.msrb.mxu1 %v148_v31  ;;  %v388_v9 = vld [vmem:[%s722_s3 + $0x78] sm:$0xff]  ;;  %v383_v15 = vld [vmem:[%s722_s3 + $0x50] sm:$0xff]  ;;  %v382_v16 = vld [vmem:[%s722_s3 + $0x48] sm:$0xff] }
  0x3c   :  { %340 = vmatpush.msrb.mxu2 %v162_v32  ;;  %359 = vmatpush.msrb.mxu3 %v179_v33  ;;  %v384_v14 = vld [vmem:[%s722_s3 + $0x58] sm:$0xff]  ;;  %v381_v17 = vld [vmem:[%s722_s3 + $0x40] sm:$0xff]  ;;  %v379_v19 = vld [vmem:[%s722_s3 + $0x30] sm:$0xff] }
  0x3d   :  { %300 = vmatpush.msrb.mxu0 %v130_v34  ;;  %319 = vmatpush.msrb.mxu1 %v147_v35  ;;  %v380_v18 = vld [vmem:[%s722_s3 + $0x38] sm:$0xff]  ;;  %v378_v20 = vld [vmem:[%s722_s3 + $0x28] sm:$0xff]  ;;  %v377_v21 = vld [vmem:[%s722_s3 + $0x20] sm:$0xff] }
  0x3e   :  { %341 = vmatpush.msrb.mxu2 %v161_v36  ;;  %360 = vmatpush.msrb.mxu3 %v178_v37  ;;  %v376_v22 = vld [vmem:[%s722_s3 + $0x18] sm:$0xff]  ;;  %v375_v23 = vld [vmem:[%s722_s3 + $0x10] sm:$0xff]  ;;  %v374_v24 = vld [vmem:[%s722_s3 + $0x8] sm:$0xff] }
  0x3f   :  { %301 = vmatpush.msrb.mxu0 %v129_v38  ;;  %320 = vmatpush.msrb.mxu1 %v146_v39  ;;  %v373_v25 = vld [vmem:[%s722_s3] sm:$0xff]  ;;  %v429_v26 = vld [vmem:[%s724_s5 + $0x78] sm:$0xff]  ;;  %v428_v27 = vld [vmem:[%s724_s5 + $0x70] sm:$0xff] }
  0x40   :  { %342 = vmatpush.msrb.mxu2 %v160_v40  ;;  %361 = vmatpush.msrb.mxu3 %v177_v41  ;;  %v427_v28 = vld [vmem:[%s724_s5 + $0x68] sm:$0xff]  ;;  %v426_v29 = vld [vmem:[%s724_s5 + $0x60] sm:$0xff]  ;;  %v425_v30 = vld [vmem:[%s724_s5 + $0x58] sm:$0xff] }
  0x41   :  { %302 = vmatpush.msrb.mxu0 %v128_v42  ;;  %321 = vmatpush.msrb.mxu1 %v145_v43  ;;  %v479_v31 = vld [vmem:[%s721_s2] ss:$0 sm:$0xff]  ;;  %v424_v32 = vld [vmem:[%s724_s5 + $0x50] sm:$0xff]  ;;  %v423_v33 = vld [vmem:[%s724_s5 + $0x48] sm:$0xff] }
  0x42   :  { %343 = vmatpush.msrb.mxu2 %v159_v44  ;;  %362 = vmatpush.msrb.mxu3 %v176_v45  ;;  %v422_v36 = vld [vmem:[%s724_s5 + $0x40] sm:$0xff]  ;;  %v421_v38 = vld [vmem:[%s724_s5 + $0x38] sm:$0xff]  ;;  %v420_v41 = vld [vmem:[%s724_s5 + $0x30] sm:$0xff] }
  0x43   :  { %268 = vmatmul.f32.vlgmr.msra.gmra.mxu2 %v198_v46  ;;  %303 = vmatpush.msrb.mxu0 %v127_v47  ;;  %v419_v44 = vld [vmem:[%s724_s5 + $0x28] sm:$0xff]  ;;  %v418_v46 = vld [vmem:[%s724_s5 + $0x20] sm:$0xff] }
  0x44   :  { %322 = vmatpush.msrb.mxu1 %v144_v48  ;;  %344 = vmatpush.msrb.mxu2 %v158_v49  ;;  %v417_v49 = vld [vmem:[%s724_s5 + $0x18] sm:$0xff] }
  0x45   :  { %363 = vmatpush.msrb.mxu3 %v175_v50  ;;  %228 = vmatmul.f32.vlgmr.msra.gmra.mxu0 %v196_v51 }
  0x46   :  { %288 = vmatmul.f32.vlgmr.msra.gmra.mxu3 %v199_v52  ;;  %304 = vmatpush.msrb.mxu0 %v126_v53 }
  0x47   :  { %323 = vmatpush.msrb.mxu1 %v143_v54  ;;  %345 = vmatpush.msrb.mxu2 %v157_v55 }
  0x48   :  { %364 = vmatpush.msrb.mxu3 %v174_v56  ;;  %248 = vmatmul.f32.vlgmr.msra.gmra.mxu1 %v197_v57  ;;  %v416_v57 = vld [vmem:[%s724_s5 + $0x10] sm:$0xff] }
  0x49   :  { %305 = vmatpush.msrb.mxu0 %v125_v58  ;;  %324 = vmatpush.msrb.mxu1 %v142_v59  ;;  %v415_v58 = vld [vmem:[%s724_s5 + $0x8] sm:$0xff]  ;;  %v414_v59 = vld [vmem:[%s724_s5] sm:$0xff] }
  0x4a   :  { %346 = vmatpush.msrb.mxu2 %v156_v60  ;;  %365 = vmatpush.msrb.mxu3 %v173_v61  ;;  %v480_v60 = vld [vmem:[%s723_s4] ss:$0 sm:$0xff] }
  0x4b   :  { %306 = vmatpush.msrb.mxu0 %v124_v62  ;;  %325 = vmatpush.msrb.mxu1 %v141_v63 }
  0x4c   :  { %347 = vmatpush.msrb.mxu2 %v155_v0  ;;  %366 = vmatpush.msrb.mxu3 %v172_v1  ;;  %v481_v0 = vld [vmem:[%s725_s6] ss:$0 sm:$0xff] }
  0x4d   :  { %348 = vmatmul.f32.vlgmr.msrb.gmra.mxu2 %v202_v2  ;;  %307 = vmatpush.msrb.mxu0 %v123_v3 }
  0x4e   :  { %326 = vmatpush.msrb.mxu1 %v140_v4  ;;  %367 = vmatpush.msrb.mxu3 %v171_v5 }
  0x4f   :  { %308 = vmatmul.f32.vlgmr.msrb.gmra.mxu0 %v200_v6  ;;  %368 = vmatmul.f32.vlgmr.msrb.gmra.mxu3 %v203_v7 }
  0x50   :  { %327 = vmatpush.msrb.mxu1 %v139_v8  ;;  %393 = vmatpush.msra.mxu0 %v388_v9 }
  0x51   :  { %328 = vmatmul.f32.vlgmr.msrb.gmra.mxu1 %v201_v10 }
  0x52   :  { %394 = vmatpush.msra.mxu0 %v387_v11  ;;  %434 = vmatpush.msra.mxu1 %v429_v26 }
  0x54   :  { %395 = vmatpush.msra.mxu0 %v386_v12  ;;  %435 = vmatpush.msra.mxu1 %v428_v27 }
  0x56   :  { %396 = vmatpush.msra.mxu0 %v385_v13  ;;  %436 = vmatpush.msra.mxu1 %v427_v28 }
  0x58   :  { %397 = vmatpush.msra.mxu0 %v384_v14  ;;  %437 = vmatpush.msra.mxu1 %v426_v29 }
  0x5a   :  { %398 = vmatpush.msra.mxu0 %v383_v15  ;;  %438 = vmatpush.msra.mxu1 %v425_v30 }
  0x5c   :  { %399 = vmatpush.msra.mxu0 %v382_v16  ;;  %439 = vmatpush.msra.mxu1 %v424_v32 }
  0x5e   :  { %400 = vmatpush.msra.mxu0 %v381_v17  ;;  %440 = vmatpush.msra.mxu1 %v423_v33 }
  0x60   :  { %401 = vmatpush.msra.mxu0 %v380_v18  ;;  %441 = vmatpush.msra.mxu1 %v422_v36 }
  0x62   :  { %402 = vmatpush.msra.mxu0 %v379_v19  ;;  %442 = vmatpush.msra.mxu1 %v421_v38 }
  0x64   :  { %403 = vmatpush.msra.mxu0 %v378_v20  ;;  %443 = vmatpush.msra.mxu1 %v420_v41 }
  0x66   :  { %404 = vmatpush.msra.mxu0 %v377_v21  ;;  %444 = vmatpush.msra.mxu1 %v419_v44 }
  0x68   :  { %405 = vmatpush.msra.mxu0 %v376_v22  ;;  %445 = vmatpush.msra.mxu1 %v418_v46 }
  0x6a   :  { %406 = vmatpush.msra.mxu0 %v375_v23  ;;  %446 = vmatpush.msra.mxu1 %v417_v49 }
  0x6c   :  { %407 = vmatpush.msra.mxu0 %v374_v24  ;;  %447 = vmatpush.msra.mxu1 %v416_v57 }
  0x6e   :  { %408 = vmatpush.msra.mxu0 %v373_v25  ;;  %448 = vmatpush.msra.mxu1 %v415_v58 }
  0x70   :  { %449 = vmatpush.msra.mxu1 %v414_v59 }
  0xc2   :  { %v229_v34 = vpop.f32.mrf.mxu0 }
  0xc3   :  { %v230_v35 = vadd.f32 %v479_v31, %v229_v34 }
  0xc5   :  { %v249_v37 = vpop.f32.mrf.mxu1 }
  0xc6   :  { %v250_v39 = vadd.f32 %v249_v37, %v230_v35  ;;  %v269_v40 = vpop.f32.mrf.mxu2 }
  0xc8   :  { %v270_v42 = vadd.f32 %v269_v40, %v250_v39 }
  0xc9   :  { %v289_v43 = vpop.f32.mrf.mxu3 }
  0xca   :  { %v290_v45 = vadd.f32 %v289_v43, %v270_v42 }
  0xcc   :  { %v309_v47 = vpop.f32.mrf.mxu0 }
  0xcd   :  { %v310_v48 = vadd.f32 %v309_v47, %v290_v45 }
  0xce   :  { %v329_v50 = vpop.f32.mrf.mxu1 }
  0xcf   :  { %v330_v51 = vadd.f32 %v329_v50, %v310_v48 }
  0xd0   :  { %v349_v52 = vpop.f32.mrf.mxu2 }
  0xd1   :  { %v350_v53 = vadd.f32 %v349_v52, %v330_v51 }
  0xd2   :  { %v369_v54 = vpop.f32.mrf.mxu3 }
  0xd3   :  { %v370_v55 = vadd.f32 %v369_v54, %v350_v53 }
  0xd5   :  { %v372_v56 = vmax.f32 %v370_v55, 0.0 }
  0xd7   :  { %409 = vmatmul.f32.vlgmr.msra.gmra.mxu0 %v372_v56 }
 0x154   :  { %v410_v61 = vpop.f32.mrf.mxu0 }
 0x155   :  { %v411_v62 = vadd.f32 %v480_v60, %v410_v61 }
 0x157   :  { %v413_v63 = vmax.f32 %v411_v62, 0.0 }
 0x159   :  { %450 = vmatmul.f32.vlgmr.msra.gmra.mxu1 %v413_v63 }
 0x1d6   :  { %v451_v1 = vpop.f32.mrf.mxu1 }
 0x1d7   :  { %v452_v2 = vadd.f32 %v481_v0, %v451_v1 }
 0x1d9   :  { %455 = vst.msk [vmem:[#allocation7] sm:$0x3] %vm454_vm0, %v452_v2 }
 0x1da   :  { %466 = dma.vmem_to_hbm [thread:$0]  %s462_s29, 32, %s464_s9, [#allocation4]  }
 0x1db   :  { %558 = dma.done.wait [#allocation4], 32  }
 0x1dc   :  { %559 = vsyncadd [#allocation4], 4294967264 }
 0x1dd   :  { %471 = vsyncpa [#allocation3], 1 }
 0x1de   :  { %472 = vsyncpa [#allocation6], 1 }
 0x1df   :  { %473 = vsyncpa [#allocation4], 1 }

</bundles_post_ra>
